<compile_context>
chip_gen: v7x
topology: tpu7x:2x2x1
jax: 0.10.0
libtpu: 0.0.40
codegen_flags: <defaults>
</compile_context>

<pallas_src>
import jax
import jax.numpy as jnp
from jax.experimental import pallas as pl
from jax.experimental.pallas import tpu as pltpu


def attn_classifier_kernel(x_ref, wcat_ref, b1_ref, w2_ref, bc_ref,
                           logits_ref, attn_ref):
    Bt, T, H = x_ref.shape
    A = b1_ref.shape[-1]          # attention MLP hidden width (24)
    C = logits_ref.shape[-1]      # number of classes

    # Flatten (batch, time) so the fused projection is one MXU pass.
    x = x_ref[...].reshape(Bt * T, H)                                   # (Bt*T, H)

    # Fused projection [W1 | Wc]: cols 0:A feed the attention MLP, cols A:A+C
    # are x @ Wc (per-timestep classifier projection).
    y = jnp.dot(x, wcat_ref[...], preferred_element_type=jnp.float32)   # (Bt*T, A+C)

    h = jnp.maximum(y[:, :A] + b1_ref[...], 0.0)                        # (Bt*T, A)
    xwc = y[:, A:A + C].reshape(Bt, T, C)                               # (Bt, T, C)

    # Second attention Linear(24, 1) as VPU multiply + lane reduce.
    # b2 is omitted: a constant added before softmax cancels exactly.
    e = jnp.sum(h.reshape(Bt, T, A) * w2_ref[...], axis=-1)             # (Bt, T)

    # Softmax over the sequence (PyTorch dim=1), numerically stable.
    m = jnp.max(e, axis=-1, keepdims=True)                              # (Bt, 1)
    p = jnp.exp(e - m)                                                  # (Bt, T)
    denom = jnp.sum(p, axis=-1, keepdims=True)                          # (Bt, 1)
    inv = pl.reciprocal(denom, approx=True)      # EUP slot (idle here)
    inv = inv * (2.0 - denom * inv)              # one Newton step -> f32-accurate
    a = p * inv                                                         # (Bt, T)

    # logits = (sum_t a_t x_t) @ Wc + bc  ==  sum_t a_t (x_t @ Wc) + bc
    logits = jnp.sum(xwc * a[:, :, None], axis=1) + bc_ref[...]         # (Bt, C)

    logits_ref[...] = logits.astype(logits_ref.dtype)
    attn_ref[...] = a.astype(attn_ref.dtype)


def attn_classifier(x, w1, b1, w2, b2, wc, bc, *, bt=8):
    """Forward of AttnClassifier. Returns (logits (B, C), attns (B, T, 1))."""
    del b2  # mathematically a no-op under the softmax; not sent to the kernel
    B, T, H = x.shape
    A = w1.shape[1]
    C = wc.shape[1]

    # Bt examples per grid step.  Either Bt is a multiple of 8 or it covers the
    # whole (padded) batch, so the output blocks satisfy the (8, 128) rule.
    if B <= bt:
        bt = B
    else:
        bt = max(8, (bt // 8) * 8)
    Bp = pl.cdiv(B, bt) * bt
    if Bp != B:
        x = jnp.concatenate(
            [x, jnp.zeros((Bp - B, T, H), x.dtype)], axis=0)

    wcat = jnp.concatenate([w1, wc], axis=1).astype(jnp.float32)   # (H, A+C)
    b1r = b1.reshape(1, A).astype(jnp.float32)
    w2r = w2.reshape(1, A).astype(jnp.float32)                     # transposed row
    bcr = bc.reshape(1, C).astype(jnp.float32)

    const = lambda shape: pl.BlockSpec(shape, lambda b: (0, 0))

    logits_p, attn_p = pl.pallas_call(
        attn_classifier_kernel,
        out_shape=(
            jax.ShapeDtypeStruct((Bp, C), jnp.float32),   # logits
            jax.ShapeDtypeStruct((Bp, T), jnp.float32),   # attention weights
        ),
        grid_spec=pltpu.PrefetchScalarGridSpec(
            num_scalar_prefetch=0,
            grid=(Bp // bt,),
            in_specs=[
                pl.BlockSpec((bt, T, H), lambda b: (b, 0, 0)),  # encoder_outputs
                const((H, A + C)),                              # [W1 | Wc]
                const((1, A)),                                  # b1
                const((1, A)),                                  # w2 (row)
                const((1, C)),                                  # bc
            ],
            out_specs=[
                pl.BlockSpec((bt, C), lambda b: (b, 0)),
                pl.BlockSpec((bt, T), lambda b: (b, 0)),
            ],
        ),
        compiler_params=pltpu.CompilerParams(
            dimension_semantics=("parallel",)),
    )(x, wcat, b1r, w2r, bcr)

    logits = logits_p[:B]
    attns = attn_p[:B, :, None]   # match the PyTorch (B, T, 1) shape
    return logits, attns


def _xavier_uniform(key, shape, gain):
    fan_in, fan_out = shape
    limit = gain * (6.0 / (fan_in + fan_out)) ** 0.5
    return jax.random.uniform(key, shape, jnp.float32, -limit, limit)


def init_params(key, h_dim, c_num):
    # xavier_uniform with gain=calculate_gain('relu')=sqrt(2) on weights
    # (as weights_init does); biases ~ uniform, deterministic from key.
    gain = 2.0 ** 0.5
    k1, k2, k3, k4, k5, k6 = jax.random.split(key, 6)
    w1 = _xavier_uniform(k1, (h_dim, 24), gain)          # Attn Linear(h_dim, 24)
    b1 = jax.random.uniform(k2, (1, 24), jnp.float32, -0.1, 0.1)
    w2 = _xavier_uniform(k3, (24, 1), gain)              # Attn Linear(24, 1)
    b2 = jax.random.uniform(k4, (1, 1), jnp.float32, -0.1, 0.1)
    wc = _xavier_uniform(k5, (h_dim, c_num), gain)       # classifier Linear(h_dim, c_num)
    bc = jax.random.uniform(k6, (1, c_num), jnp.float32, -0.1, 0.1)
    return w1, b1, w2, b2, wc, bc


def reference(x, w1, b1, w2, b2, wc, bc):
    # pure-JAX mirror of the PyTorch forward (keeps b2, which cancels in softmax)
    e = jnp.maximum(x @ w1 + b1, 0.0) @ w2 + b2          # (B, T, 1)
    a = jax.nn.softmax(e[..., 0], axis=1)[..., None]     # (B, T, 1)
    feats = (x * a).sum(axis=1)                          # (B, H)
    return feats @ wc + bc, a


if __name__ == "__main__":
    B, T, H, C = 16, 8, 32, 4
    key = jax.random.PRNGKey(0)
    kx, kp = jax.random.split(key)
    x = jax.random.normal(kx, (B, T, H), jnp.float32)
    params = init_params(kp, H, C)

    logits, attns = attn_classifier(x, *params, bt=8)
    jax.block_until_ready((logits, attns))

    logits_ref, attns_ref = reference(x, *params)
    assert logits.shape == (B, C) and attns.shape == (B, T, 1)
    assert jnp.allclose(logits, logits_ref, atol=1e-4, rtol=1e-4)
    assert jnp.allclose(attns, attns_ref, atol=1e-4, rtol=1e-4)
    print("KERNEL_OK")
</pallas_src>

<mosaic_0001>
module attributes {stable_mosaic.version = 11 : i64} {
  func.func @attn_classifier_kernel(%arg0: i32, %arg1: memref<8x8x32xf32, #tpu.memory_space<vmem>>, %arg2: memref<32x28xf32, #tpu.memory_space<vmem>>, %arg3: memref<1x24xf32, #tpu.memory_space<vmem>>, %arg4: memref<1x24xf32, #tpu.memory_space<vmem>>, %arg5: memref<1x4xf32, #tpu.memory_space<vmem>>, %arg6: memref<8x4xf32, #tpu.memory_space<vmem>>, %arg7: memref<8x8xf32, #tpu.memory_space<vmem>>) attributes {dimension_semantics = [#tpu.dimension_semantics<parallel>], iteration_bounds = array<i64: 2>, scalar_prefetch = 0 : i64, scratch_operands = 0 : i64, tpu.core_type = #tpu.core_type<tc>, window_params = [{transform_indices = @transform_0, window_bounds = array<i64: 8, 8, 32>}, {pipeline_mode = #tpu.pipeline_mode<synchronous>, transform_indices = @transform_1, window_bounds = array<i64: 32, 28>}, {pipeline_mode = #tpu.pipeline_mode<synchronous>, transform_indices = @transform_2, window_bounds = array<i64: 1, 24>}, {pipeline_mode = #tpu.pipeline_mode<synchronous>, transform_indices = @transform_3, window_bounds = array<i64: 1, 24>}, {pipeline_mode = #tpu.pipeline_mode<synchronous>, transform_indices = @transform_4, window_bounds = array<i64: 1, 4>}, {transform_indices = @transform_5, window_bounds = array<i64: 8, 4>}, {transform_indices = @transform_6, window_bounds = array<i64: 8, 8>}]} {
    %c0 = arith.constant 0 : index
    %c0_0 = arith.constant 0 : index
    %c0_1 = arith.constant 0 : index
    %0 = vector.load %arg1[%c0, %c0_0, %c0_1] : memref<8x8x32xf32, #tpu.memory_space<vmem>>, vector<8x8x32xf32>
    %1 = vector.shape_cast %0 : vector<8x8x32xf32> to vector<64x32xf32>
    %c0_2 = arith.constant 0 : index
    %c0_3 = arith.constant 0 : index
    %2 = vector.load %arg2[%c0_2, %c0_3] : memref<32x28xf32, #tpu.memory_space<vmem>>, vector<32x28xf32>
    %cst = arith.constant dense<0.000000e+00> : vector<64x28xf32>
    %3 = tpu.matmul %1, %2, %cst {dimension_numbers = #tpu.dot_dimension_numbers<[1], [0], [0], [1], [0, 0, 1, 1], [], []>} : vector<64x32xf32>, vector<32x28xf32>, vector<64x28xf32> -> vector<64x28xf32>
    %4 = vector.extract_strided_slice %3 {offsets = [0, 0], sizes = [64, 24], strides = [1, 1]} : vector<64x28xf32> to vector<64x24xf32>
    %c0_4 = arith.constant 0 : index
    %c0_5 = arith.constant 0 : index
    %5 = vector.load %arg3[%c0_4, %c0_5] : memref<1x24xf32, #tpu.memory_space<vmem>>, vector<1x24xf32>
    %6 = vector.broadcast %5 : vector<1x24xf32> to vector<64x24xf32>
    %7 = arith.addf %4, %6 : vector<64x24xf32>
    %cst_6 = arith.constant 0.000000e+00 : f32
    %8 = vector.broadcast %cst_6 : f32 to vector<64x24xf32>
    %9 = arith.maximumf %7, %8 : vector<64x24xf32>
    %10 = vector.extract_strided_slice %3 {offsets = [0, 24], sizes = [64, 4], strides = [1, 1]} : vector<64x28xf32> to vector<64x4xf32>
    %11 = vector.shape_cast %10 : vector<64x4xf32> to vector<8x8x4xf32>
    %12 = vector.shape_cast %9 : vector<64x24xf32> to vector<8x8x24xf32>
    %c0_7 = arith.constant 0 : index
    %c0_8 = arith.constant 0 : index
    %13 = vector.load %arg4[%c0_7, %c0_8] : memref<1x24xf32, #tpu.memory_space<vmem>>, vector<1x24xf32>
    %14 = vector.shape_cast %13 : vector<1x24xf32> to vector<1x1x24xf32>
    %15 = vector.broadcast %14 : vector<1x1x24xf32> to vector<8x8x24xf32>
    %16 = arith.mulf %12, %15 : vector<8x8x24xf32>
    %cst_9 = arith.constant dense<0.000000e+00> : vector<8x8xf32>
    %17 = vector.multi_reduction <add>, %16, %cst_9 [2] : vector<8x8x24xf32> to vector<8x8xf32>
    %cst_10 = arith.constant dense<0xFF800000> : vector<8xf32>
    %18 = vector.multi_reduction <maximumf>, %17, %cst_10 [1] : vector<8x8xf32> to vector<8xf32>
    %19 = vector.shape_cast %18 : vector<8xf32> to vector<8x1xf32>
    %20 = vector.broadcast %19 : vector<8x1xf32> to vector<8x8xf32>
    %21 = arith.subf %17, %20 : vector<8x8xf32>
    %22 = math.exp %21 : vector<8x8xf32>
    %cst_11 = arith.constant dense<0.000000e+00> : vector<8xf32>
    %23 = vector.multi_reduction <add>, %22, %cst_11 [1] : vector<8x8xf32> to vector<8xf32>
    %24 = vector.shape_cast %23 : vector<8xf32> to vector<8x1xf32>
    %25 = tpu.reciprocal %24 {approx = true} : vector<8x1xf32> -> vector<8x1xf32>
    %26 = arith.mulf %24, %25 : vector<8x1xf32>
    %cst_12 = arith.constant 2.000000e+00 : f32
    %27 = vector.broadcast %cst_12 : f32 to vector<8x1xf32>
    %28 = arith.subf %27, %26 : vector<8x1xf32>
    %29 = arith.mulf %25, %28 : vector<8x1xf32>
    %30 = vector.broadcast %29 : vector<8x1xf32> to vector<8x8xf32>
    %31 = arith.mulf %22, %30 : vector<8x8xf32>
    %32 = vector.shape_cast %31 : vector<8x8xf32> to vector<8x8x1xf32>
    %33 = vector.broadcast %32 : vector<8x8x1xf32> to vector<8x8x4xf32>
    %34 = arith.mulf %11, %33 : vector<8x8x4xf32>
    %cst_13 = arith.constant dense<0.000000e+00> : vector<8x4xf32>
    %35 = vector.multi_reduction <add>, %34, %cst_13 [1] : vector<8x8x4xf32> to vector<8x4xf32>
    %c0_14 = arith.constant 0 : index
    %c0_15 = arith.constant 0 : index
    %36 = vector.load %arg5[%c0_14, %c0_15] : memref<1x4xf32, #tpu.memory_space<vmem>>, vector<1x4xf32>
    %37 = vector.broadcast %36 : vector<1x4xf32> to vector<8x4xf32>
    %38 = arith.addf %35, %37 : vector<8x4xf32>
    %c0_16 = arith.constant 0 : index
    %c0_17 = arith.constant 0 : index
    %39 = vector.load %arg6[%c0_16, %c0_17] : memref<8x4xf32, #tpu.memory_space<vmem>>, vector<8x4xf32>
    tpu.vector_store %arg6[%c0_16, %c0_17], %38 {strides = array<i32>} : memref<8x4xf32, #tpu.memory_space<vmem>>, vector<8x4xf32>,
    %c0_18 = arith.constant 0 : index
    %c0_19 = arith.constant 0 : index
    %40 = vector.load %arg7[%c0_18, %c0_19] : memref<8x8xf32, #tpu.memory_space<vmem>>, vector<8x8xf32>
    tpu.vector_store %arg7[%c0_18, %c0_19], %31 {strides = array<i32>} : memref<8x8xf32, #tpu.memory_space<vmem>>, vector<8x8xf32>,
    return
  }
  func.func @transform_0(%arg0: i32) -> (i32, i32, i32) {
    %c0_i32 = arith.constant 0 : i32
    %c0_i32_0 = arith.constant 0 : i32
    %c0_i32_1 = arith.constant 0 : i32
    return %arg0, %c0_i32, %c0_i32_0 : i32, i32, i32
  }
  func.func @transform_1(%arg0: i32) -> (i32, i32) {
    %c0_i32 = arith.constant 0 : i32
    %c0_i32_0 = arith.constant 0 : i32
    %c0_i32_1 = arith.constant 0 : i32
    return %c0_i32, %c0_i32_0 : i32, i32
  }
  func.func @transform_2(%arg0: i32) -> (i32, i32) {
    %c0_i32 = arith.constant 0 : i32
    %c0_i32_0 = arith.constant 0 : i32
    %c0_i32_1 = arith.constant 0 : i32
    return %c0_i32, %c0_i32_0 : i32, i32
  }
  func.func @transform_3(%arg0: i32) -> (i32, i32) {
    %c0_i32 = arith.constant 0 : i32
    %c0_i32_0 = arith.constant 0 : i32
    %c0_i32_1 = arith.constant 0 : i32
    return %c0_i32, %c0_i32_0 : i32, i32
  }
  func.func @transform_4(%arg0: i32) -> (i32, i32) {
    %c0_i32 = arith.constant 0 : i32
    %c0_i32_0 = arith.constant 0 : i32
    %c0_i32_1 = arith.constant 0 : i32
    return %c0_i32, %c0_i32_0 : i32, i32
  }
  func.func @transform_5(%arg0: i32) -> (i32, i32) {
    %c0_i32 = arith.constant 0 : i32
    %c0_i32_0 = arith.constant 0 : i32
    return %arg0, %c0_i32 : i32, i32
  }
  func.func @transform_6(%arg0: i32) -> (i32, i32) {
    %c0_i32 = arith.constant 0 : i32
    %c0_i32_0 = arith.constant 0 : i32
    return %arg0, %c0_i32 : i32, i32
  }
}

</mosaic_0001>

<bundles_post_ra>
// kernel: tpu_custom_call.1
= control target key start
LH: loop header
LB: loop body
LE: loop exit
PB: predicated region body
PF: predicated region fallthrough
CT: control target
= control target key end

     0   :  { %12 = vsyncpa [#allocation3], 0  ;;  %s1686_s0 = inlined_call_operand.hbm [shape: f32[16,8,32], index: 0, kind: input, shape index: {}]   ;;  %s1687_s1 = inlined_call_operand.hbm [shape: f32[32,28], index: 1, kind: input, shape index: {}]   ;;  %s1688_s2 = inlined_call_operand.vmem [shape: f32[1,24], index: 2, kind: input, shape index: {}]   ;;  %s1689_s3 = inlined_call_operand.vmem [shape: f32[1,24], index: 3, kind: input, shape index: {}]   ;;  %s1690_s4 = inlined_call_operand.vmem [shape: f32[1,4], index: 4, kind: input, shape index: {}]   ;;  %s1691_s5 = inlined_call_operand.vmem [shape: f32[16,4], index: 5, kind: output, shape index: {0}]   ;;  %s1692_s6 = inlined_call_operand.vmem [shape: f32[16,8], index: 6, kind: output, shape index: {1}]  }
   0x1   :  { %14 = vsyncpa [#allocation3 + $0x1], 0 }
   0x2   :  { %15 = vsyncpa [#allocation5], 0  ;;  %s1337_s21 = smov 0   ;;  %s1339_s22 = smov 0  }
   0x3   :  { %s1341_s23 = smov 0   ;;  %s1343_s24 = smov 0  }
   0x4 LB: > { %s1356_s25 = sadd.s32 4294967295, %s1293_s24   ;;  %p41_p0 = scmp.ne.s32.totalorder %s1285_s22, %s1281_s21  ;;  %s1293_s24 = sphi %s1343_s24, %s1707_s24   ;;  %s1289_s23 = sphi %s1341_s23, %s1706_s23   ;;  %s1285_s22 = sphi %s1339_s22, %s1705_s22   ;;  %s1281_s21 = sphi %s1337_s21, %s1704_s21  }
   0x5   : > { %p1693_p1 = scmp.eq.s32.totalorder %s1356_s25, 0  ;;  %p1053_p2 = scmp.ge.s32.totalorder %s1293_s24, 1 }
   0x6   : > { %p188_p3 = scmp.lt.s32.totalorder %s1293_s24, 3  ;;  %s1295_s28 = smov [#allocation4]  }
   0x7   : > { %p1364_p4 = por %p1693_p1, %p41_p0  ;;  %s200_s29 = sshll.u32 %s1295_s28, 4  ;;  %s201_s29 = int_to_ptr.vmem [resolvable:$true] %s200_s29 }
   0x8   : > { %p1368_p5 = pnand %p1053_p2, %p188_p3  ;;  %s1381_s7 = sadd.s32 1, %s1293_s24  }
   0x9   : > { %s1696_s26 = scalar_select %p1364_p4, 1, 0 }
   0xa   : > { %s1697_s27 = scalar_select %p1368_p5, 1, 0 }
   0xb   : > { %p1128_p6 = pneg %p1368_p5  ;;  %s28_s8 = sadd.s32 1, %s1289_s23 }
   0xc   : > { %s25_s9 = ssub.s32 %s1293_s24, %s1381_s7  ;;  %s1197_s12 = scalar_lea.hbm %s1687_s1, 512 }
   0xd   : > { %p1376_p7 = pnand %p1128_p6, %p1693_p1  ;;  %p1198_p8 = scmp.ne.s32.totalorder %s1687_s1, %s1197_s12 }
   0xe   : > { %p1204_p12 = scmp.lt.u32.totalorder %s1197_s12, %s1687_s1 }
   0xf   : > { %p1199_p9 = pneg %p1376_p7 }
  0x11   : > { %p1200_p10 = pnand %p1199_p9, %p1198_p8 }
  0x13   : > { %p1201_p11 = pneg %p1200_p10 }
  0x15   : > { %p1206_p13 = pnand %p1204_p12, %p1201_p11 }
  0x17   : > { %1209 = shalt.err (!%p1206_p13)
}
  0x18   : > { %s1210_s17 = scalar_lea.vmem %s201_s29, 512  ;;  %p1218_p6 = scmp.lt.s32.totalorder %s201_s29, %s201_s29 }
  0x19   : > { %p1211_p0 = scmp.ne.s32.totalorder %s201_s29, %s1210_s17  ;;  %p1219_p1 = scmp.lt.s32.totalorder %s1210_s17, %s1210_s17 }
  0x1b   : > { %p1213_p2 = pnand %p1211_p0, %p1199_p9  ;;  %p1220_p4 = por %p1219_p1, %p1218_p6 }
  0x1d   : > { %p1214_p3 = pneg %p1213_p2 }
  0x1f   : > { %p1221_p5 = pnand %p1220_p4, %p1214_p3 }
  0x21   : > { %1224 = shalt.err (!%p1221_p5)
}
  0x22   : > { %s1296_s18 = smov 128   ;;  %s1297_s19 = smov 8  }
  0x23   : > { %1131 = dma.hbm_to_vmem [thread:$0]  (!%p1376_p7), %s1687_s1, 512, %s201_s29, [#allocation5], %s1296_s18, %s1296_s18, %s1297_s19  }
  0x24   : > { %p26_p1 = scmp.eq.s32.totalorder %s25_s9, 0  ;;  %p35_p4 = scmp.ne.s32.totalorder %s1289_s23, %s1285_s22 }
  0x25   : > { %p36_p5 = scmp.eq.s32.totalorder %s1293_s24, 0  ;;  %p1137_p8 = scmp.lt.s32.totalorder %s1293_s24, 2 }
  0x26   : > { %s1410_s28 = scalar_select %p26_p1, %s1289_s23, %s28_s8  }
  0x27   : > { %p37_p9 = por %p36_p5, %p35_p4  ;;  %s223_s10 = sand.u32 1, %s1289_s23  }
  0x28   : > { %s1056_s11 = sshll.u32 %s223_s10, 6  ;;  %s1077_s12 = sshll.u32 %s1293_s24, 10 }
  0x29   : > { %s1417_s30 = scalar_lea.hbm %s1686_s0, %s1077_s12  ;;  %s227_s29 = scalar_lea.vmem [#allocation2], %s1056_s11 }
  0x2a   : > { %s234_s9 = sshll.u32 %s227_s29, 4  ;;  %p1421_p7 = pnand %p1137_p8, %p37_p9  ;;  %s1419_s9 = int_to_ptr.vmem [resolvable:$true] %s234_s9 }
  0x2b   : > { %s1425_s24 = scalar_lea.sflag [#allocation3], %s223_s10  ;;  %s1225_s15 = scalar_lea.hbm %s1417_s30, 1024 }
  0x2c   : > { %p1226_p10 = scmp.ne.s32.totalorder %s1417_s30, %s1225_s15  ;;  %p1227_p11 = pneg %p1421_p7 }
  0x2d   : > { %s1230_s20 = scalar_lea.hbm %s1686_s0, 2048  ;;  %p1231_p0 = scmp.lt.u32.totalorder %s1417_s30, %s1686_s0 }
  0x2e   : > { %p1228_p12 = pnand %p1227_p11, %p1226_p10  ;;  %p1232_p2 = scmp.lt.u32.totalorder %s1230_s20, %s1225_s15 }
  0x2f   : > { %p1234_p6 = scmp.lt.u32.totalorder %s1225_s15, %s1417_s30 }
  0x30   : > { %p1229_p13 = pneg %p1228_p12  ;;  %p1233_p3 = por %p1232_p2, %p1231_p0 }
  0x32   : > { %p1235_p1 = por %p1234_p6, %p1233_p3 }
  0x34   : > { %p1236_p4 = pnand %p1235_p1, %p1229_p13 }
  0x36   : > { %1239 = shalt.err (!%p1236_p4)
}
  0x37   : > { %s1240_s10 = scalar_lea.vmem %s1419_s9, 1024  ;;  %s1298_s12 = smov [#allocation2]  }
  0x38   : > { %p1241_p5 = scmp.ne.s32.totalorder %s1419_s9, %s1240_s10  ;;  %s1245_s13 = sshll.u32 %s1298_s12, 4  ;;  %s1246_s13 = int_to_ptr.vmem [resolvable:$false] %s1245_s13 }
  0x39   : > { %s1247_s14 = scalar_lea.vmem %s1246_s13, 2048  ;;  %p1248_p10 = scmp.lt.s32.totalorder %s1419_s9, %s1246_s13 }
  0x3a   : > { %p1243_p8 = pnand %p1241_p5, %p1227_p11  ;;  %p1249_p12 = scmp.lt.s32.totalorder %s1247_s14, %s1240_s10 }
  0x3c   : > { %p1244_p9 = pneg %p1243_p8  ;;  %p1250_p0 = por %p1249_p12, %p1248_p10 }
  0x3e   : > { %p1251_p2 = pnand %p1250_p0, %p1244_p9 }
  0x40   : > { %1254 = shalt.err (!%p1251_p2)
}
  0x41   : > { %1135 = dma.hbm_to_vmem [thread:$0]  (!%p1421_p7), %s1417_s30, 1024, %s1419_s9, %s1425_s24, %s1296_s18, %s1296_s18, %s1297_s19  }
  0x42   : > { %p1700_p11 = scmp.ne.s32.totalorder %s1697_s27, 0 }
  0x43   : > { %s248_s29 = sand.u32 (!%p1700_p11), 1, %s1285_s22   ;;  %p1701_p13 = scmp.ne.s32.totalorder (!%p1700_p11), %s1696_s26, 0 }
  0x44   : > { %246 = sbr.rel (%p1700_p11) target bundleno = 1241 (0x4d9), region = 40  ;;  %s1060_s15 = sshll.u32 (!%p1700_p11), %s248_s29, 6 }
  0x45   : > { %s249_s16 = scalar_lea.sflag (!%p1700_p11), [#allocation3], %s248_s29  ;;  %s1459_s17 = scalar_lea.vmem (!%p1700_p11), [#allocation2], %s1060_s15 }
  0x4b   : > { %1272 = dma.done.wait (%p1701_p13), %s249_s16, 1024  }
  0x4c   : > { %1274 = vsyncadd (%p1701_p13), %s249_s16, 4294966272  ;;  %p1702_p3 = scmp.eq.s32.totalorder %s1356_s25, 0 }
  0x4e   : > { %1276 = dma.done.wait (%p1702_p3), [#allocation5], 512   ;;  %p1703_p7 = pmov %p1702_p3 }
  0x4f   : > { %vm309_vm0 = vcmask 261120   ;;  %v305_v0 = vld [vmem:[#allocation4] sm:$0xff]  ;;  %v306_v1 = vld [vmem:[#allocation4 + $0x8] sm:$0xff]  ;;  %v307_v2 = vld [vmem:[#allocation4 + $0x10] sm:$0xff]  ;;  %vm477_vm1 = vcmask 195584   ;;  %v510_v56 = vlaneseq  ;;  %vm544_vm2 = vcmask 1041409  }
  0x50   : > { %1278 = vsyncadd (%p1703_p7), [#allocation5], 4294966784  ;;  %v1110_v3 = vpack.c.bf16 %v306_v1, %v305_v0  ;;  %v308_v4 = vld [vmem:[#allocation4 + $0x18] sm:$0xff]  ;;  %v297_v5 = vld [vmem:[%s1459_s17] sm:$0xff]  ;;  %vm546_vm3 = vcmask 1042434   ;;  %vm548_vm4 = vcmask 1043459  }
  0x51   : > { %v1114_v6 = vpack.c.bf16 %v308_v4, %v307_v2  ;;  %1098 = vmatprep.mubr.msk.f32.mxu0 %vm309_vm0, %v297_v5  ;;  %v301_v7 = vld [vmem:[%s1459_s17 + $0x20] sm:$0xff]  ;;  %v298_v8 = vld [vmem:[%s1459_s17 + $0x8] sm:$0xff]  ;;  %v299_v10 = vld [vmem:[%s1459_s17 + $0x10] sm:$0xff]  ;;  %v511_v57 = vand.u32 127, %v510_v56  ;;  %v1523_v58 = vshrl.u32 %v510_v56, 7  ;;  %vm550_vm5 = vcmask 1044484  }
  0x52   : > { %1111 = vmatprep.subr.bf16.mxu0 %v1110_v3  ;;  %1118 = vmatprep.subr.bf16.mxu1 %v1110_v3  ;;  %v302_v9 = vld [vmem:[%s1459_s17 + $0x28] sm:$0xff]  ;;  %v303_v11 = vld [vmem:[%s1459_s17 + $0x30] sm:$0xff]  ;;  %v300_v12 = vld [vmem:[%s1459_s17 + $0x18] sm:$0xff]  ;;  %vm552_vm6 = vcmask 1045509   ;;  %vm554_vm7 = vcmask 1046534   ;;  %vm556_vm8 = vcmask 1047559  }
  0x53   : > { %1113 = vmatpush3.bf16.msra.mxu0 %v1110_v3  ;;  %1120 = vmatpush3.bf16.msra.mxu1 %v1110_v3  ;;  %v304_v13 = vld [vmem:[%s1459_s17 + $0x38] sm:$0xff]  ;;  %v1072_v14 = vld [vmem:[%s1688_s2] ss:$0 sm:$0xff]  ;;  %v1526_v60 = vsub.s32 %v511_v57, %v1523_v58  ;;  %vm559_vm9 = vcmask 64512   ;;  %s1300_s8 = smov 24   ;;  %vm804_vm10 = vcmask 228544  }
  0x54   : > { %1115 = vmatprep.subr.bf16.mxu0 %v1114_v6  ;;  %1119 = vmatprep.subr.bf16.mxu1 %v1114_v6  ;;  %v1073_v21 = vld [vmem:[%s1689_s3] ss:$0 sm:$0xff]  ;;  %p289_p6 = scmp.lt.s32.totalorder %s1356_s25, 1  ;;  %s1301_s10 = smov 104   ;;  %vm903_vm11 = vcmask 31744  }
  0x55   : > { %1104 = vmatprep.mubr.msk.f32.mxu1 %vm309_vm0, %v301_v7 }
  0x56   : > { %s1709_s25 = smov (!%p289_p6, %s1356_s25), 1 }
  0x57   : > { %1117 = vmatpush3.bf16.msra.mxu0 %v1114_v6  ;;  %1121 = vmatpush3.bf16.msra.mxu1 %v1114_v6  ;;  %s1062_s24 = sshll.u32 %s1709_s25, 3 }
  0x58   : > { %s296_s11 = scalar_lea.vmem %s1692_s6, %s1062_s24  ;;  %s292_s14 = scalar_lea.vmem %s1691_s5, %s1062_s24 }
  0x5a   : > { %1099 = vmatmul.mubr.msk.f32.vlgmr.msra.gmra.mrb[0].mxu0 %vm309_vm0, %v298_v8  ;;  %1105 = vmatmul.mubr.msk.f32.vlgmr.msra.gmra.mrb[0].mxu1 %vm309_vm0, %v302_v9 }
  0x5b   : > { %1101 = vmatprep.mubr.msk.f32.mxu0 %vm309_vm0, %v299_v10  ;;  %1107 = vmatprep.mubr.msk.f32.mxu1 %vm309_vm0, %v303_v11 }
  0x5e   : > { %1102 = vmatmul.mubr.msk.f32.gmra.mrb[2].mxu0 %vm309_vm0, %v300_v12  ;;  %1108 = vmatmul.mubr.msk.f32.gmra.mrb[2].mxu1 %vm309_vm0, %v304_v13 }
 0x12d   : > { %v1488_v15 = vpop.f32.mrb[0].mxu0  ;;  %v1490_v16 = vpop.f32.mrb[0].mxu1 }
 0x12e   : > { %v447_v17 = vadd.f32 %v1488_v15, %v1072_v14  ;;  %v1493_v18 = vpop.f32.mrb[1].mxu0  ;;  %v1495_v19 = vpop.f32.mrb[1].mxu1  ;;  %v451_v33 = vadd.f32 %v1490_v16, %v1072_v14 }
 0x12f   : > { %v446_v20 = vadd.f32 %v1072_v14, %v1493_v18  ;;  %v450_v22 = vadd.f32 %v1072_v14, %v1495_v19 }
 0x130   : > { %v455_v23 = vmax.f32 %v447_v17, 0.0  ;;  %v459_v42 = vmax.f32 %v451_v33, 0.0 }
 0x131   : > { %v454_v24 = vmax.f32 %v446_v20, 0.0  ;;  %v1502_v25 = vpop.f32.mrb[2].mxu0  ;;  %v1504_v26 = vpop.f32.mrb[2].mxu1  ;;  %v458_v30 = vmax.f32 %v450_v22, 0.0 }
 0x132   : > { %v449_v27 = vadd.f32 %v1502_v25, %v1072_v14  ;;  %v1507_v28 = vpop.f32.mrb[3].mxu0  ;;  %v470_v29 = vmul.f32 %v1073_v21, %v455_v23  ;;  %v1509_v31 = vpop.f32.mrb[3].mxu1  ;;  %v453_v43 = vadd.f32 %v1504_v26, %v1072_v14  ;;  %v474_v51 = vmul.f32 %v1073_v21, %v459_v42 }
 0x133   : > { %v448_v32 = vadd.f32 %v1072_v14, %v1507_v28  ;;  %v452_v34 = vadd.f32 %v1072_v14, %v1509_v31  ;;  %v469_v37 = vmul.f32 %v1073_v21, %v454_v24  ;;  %v473_v41 = vmul.f32 %v1073_v21, %v458_v30 }
 0x134   : > { %v457_v35 = vmax.f32 %v449_v27, 0.0  ;;  %v481_v36 = vsel %vm477_vm1, %v470_v29, 0.0  ;;  %v461_v49 = vmax.f32 %v453_v43, 0.0  ;;  %v493_v53 = vsel %vm477_vm1, %v474_v51, 0.0 }
 0x135   : > { %v456_v38 = vmax.f32 %v448_v32, 0.0  ;;  %482 = vadd.xlane.f32.xlu0 %v481_v36  ;;  %v460_v40 = vmax.f32 %v452_v34, 0.0  ;;  %v478_v44 = vsel %vm477_vm1, %v469_v37, 0.0  ;;  %v490_v47 = vsel %vm477_vm1, %v473_v41, 0.0 }
 0x136   : > { %v472_v39 = vmul.f32 %v1073_v21, %v457_v35  ;;  %v476_v54 = vmul.f32 %v1073_v21, %v461_v49  ;;  %v1299_v24 = vmov 0   ;;  %v566_v27 = vsub.s32 0, %v1523_v58 }
 0x137   : > { %v471_v46 = vmul.f32 %v1073_v21, %v456_v38  ;;  %v475_v48 = vmul.f32 %v1073_v21, %v460_v40  ;;  %1178 = vset.pattern.permute.xlu0 %v1299_v24  ;;  %1177 = vset.pattern.permute.xlu1 %v1299_v24  ;;  %v570_v29 = vsub.s32 1, %v1523_v58  ;;  %v574_v30 = vsub.s32 2, %v1523_v58 }
 0x138   : > { %v487_v45 = vsel %vm477_vm1, %v472_v39, 0.0  ;;  %v499_v55 = vsel %vm477_vm1, %v476_v54, 0.0  ;;  %v578_v32 = vsub.s32 3, %v1523_v58  ;;  %v582_v37 = vsub.s32 4, %v1523_v58 }
 0x139   : > { %479 = vadd.xlane.f32.xlu0 %v478_v44  ;;  %488 = vadd.xlane.f32.xlu1 %v487_v45  ;;  %v484_v50 = vsel %vm477_vm1, %v471_v46, 0.0  ;;  %v496_v52 = vsel %vm477_vm1, %v475_v48, 0.0  ;;  %v586_v44 = vsub.s32 5, %v1523_v58  ;;  %v590_v48 = vsub.s32 6, %v1523_v58 }
 0x13d   : > { %485 = vadd.xlane.f32.xlu1 %v484_v50  ;;  %491 = vadd.xlane.f32.xlu0 %v490_v47 }
 0x141   : > { %494 = vadd.xlane.f32.xlu1 %v493_v53  ;;  %497 = vadd.xlane.f32.xlu0 %v496_v52  ;;  %v594_v52 = vsub.s32 7, %v1523_v58 }
 0x145   : > { %500 = vadd.xlane.f32.xlu1 %v499_v55 }
 0x1c2   : > { %v483_v59 = vpop.xlane.xlu0 %482 }
 0x1c3   : > { %v519_v0 = vrot.slane %v483_v59, %v1526_v60 }
 0x1c6   : > { %v480_v61 = vpop.xlane.xlu0 %479  ;;  %v489_v62 = vpop.xlane.xlu1 %488 }
 0x1c7   : > { %v515_v63 = vrot.slane %v480_v61, %v1526_v60  ;;  %v527_v6 = vrot.slane %v489_v62, %v1526_v60 }
 0x1c9   : > { %v545_v5 = vsel %vm544_vm2, %v519_v0, %v515_v63 }
 0x1ca   : > { %v486_v1 = vpop.xlane.xlu1 %485  ;;  %v492_v2 = vpop.xlane.xlu0 %491 }
 0x1cb   : > { %v523_v3 = vrot.slane %v486_v1, %v1526_v60  ;;  %v531_v4 = vrot.slane %v492_v2, %v1526_v60 }
 0x1cd   : > { %v547_v7 = vsel %vm546_vm3, %v523_v3, %v545_v5 }
 0x1ce   : > { %v549_v8 = vsel %vm548_vm4, %v527_v6, %v547_v7  ;;  %v495_v9 = vpop.xlane.xlu1 %494  ;;  %v498_v10 = vpop.xlane.xlu0 %497 }
 0x1cf   : > { %v551_v11 = vsel %vm550_vm5, %v531_v4, %v549_v8  ;;  %v535_v12 = vrot.slane %v495_v9, %v1526_v60  ;;  %v539_v13 = vrot.slane %v498_v10, %v1526_v60 }
 0x1d1   : > { %v553_v14 = vsel %vm552_vm6, %v535_v12, %v551_v11 }
 0x1d2   : > { %v501_v17 = vpop.xlane.xlu1 %500  ;;  %v555_v21 = vsel %vm554_vm7, %v539_v13, %v553_v14 }
 0x1d3   : > { %v543_v20 = vrot.slane %v501_v17, %v1526_v60 }
 0x1d5   : > { %v557_v22 = vsel %vm556_vm8, %v543_v20, %v555_v21 }
 0x1d6   : > { %v560_v23 = vsel %vm559_vm9, %v557_v22, -inf }
 0x1d7   : > { %561 = vmax.xlane.f32.xlu0 %v560_v23 }
 0x264   : > { %v562_v33 = vpop.xlane.xlu0 %561 }
 0x265   : > { %v567_v34 = vrot.slane %v562_v33, %v566_v27  ;;  %v571_v35 = vrot.slane %v562_v33, %v570_v29  ;;  %v575_v36 = vrot.slane %v562_v33, %v574_v30  ;;  %v579_v38 = vrot.slane %v562_v33, %v578_v32 }
 0x266   : > { %v583_v45 = vrot.slane %v562_v33, %v582_v37  ;;  %v587_v49 = vrot.slane %v562_v33, %v586_v44  ;;  %v591_v53 = vrot.slane %v562_v33, %v590_v48 }
 0x267   : > { %v604_v39 = vsub.f32 %v480_v61, %v567_v34  ;;  %v605_v40 = vsub.f32 %v483_v59, %v571_v35  ;;  %v606_v41 = vsub.f32 %v486_v1, %v575_v36  ;;  %v607_v46 = vsub.f32 %v489_v62, %v579_v38 }
 0x268   : > { %v608_v50 = vsub.f32 %v492_v2, %v583_v45  ;;  %v609_v54 = vsub.f32 %v495_v9, %v587_v49  ;;  %v595_v59 = vrot.slane %v562_v33, %v594_v52  ;;  %v610_v61 = vsub.f32 %v498_v10, %v591_v53 }
 0x269   : > { %v612_v42 = vmul.f32 1.442695, %v604_v39  ;;  %v614_v43 = vmul.f32 1.442695, %v605_v40  ;;  %v616_v47 = vmul.f32 1.442695, %v606_v41 }
 0x26a   : > { %v618_v51 = vmul.f32 1.442695, %v607_v46  ;;  %v620_v55 = vmul.f32 1.442695, %v608_v50  ;;  %v622_v62 = vmul.f32 1.442695, %v609_v54  ;;  %v611_v0 = vsub.f32 %v501_v17, %v595_v59 }
 0x26b   : > { %1179 = vpow2.f32 %v612_v42  ;;  %v624_v1 = vmul.f32 1.442695, %v610_v61  ;;  %v1074_v46 = vld [vmem:[%s1690_s4] ss:$0 sm:$0xff] }
 0x26c   : > { %1181 = vpow2.f32 %v614_v43  ;;  %v626_v3 = vmul.f32 1.442695, %v611_v0 }
 0x26d   : > { %1183 = vpow2.f32 %v616_v47 }
 0x26e   : > { %1185 = vpow2.f32 %v618_v51 }
 0x26f   : > { %1187 = vpow2.f32 %v620_v55 }
 0x270   : > { %1189 = vpow2.f32 %v622_v62 }
 0x271   : > { %1191 = vpow2.f32 %v624_v1 }
 0x272   : > { %1193 = vpow2.f32 %v626_v3 }
 0x275   : > { %v1566_v56 = vpop.eup %1179 }
 0x276   : > { %v1182_v57 = vpop.eup %1181  ;;  %637 = vperm.xlu1 %1177, %v1566_v56  }
 0x277   : > { %640 = vperm.xlu0 %1178, %v1182_v57   ;;  %v1184_v63 = vpop.eup %1183 }
 0x278   : > { %v1186_v2 = vpop.eup %1185 }
 0x279   : > { %v1188_v4 = vpop.eup %1187 }
 0x27a   : > { %643 = vperm.xlu1 %1177, %v1184_v63   ;;  %v1190_v5 = vpop.eup %1189 }
 0x27b   : > { %v1192_v6 = vpop.eup %1191 }
 0x27c   : > { %v1194_v7 = vpop.eup %1193 }
 0x27e   : > { %646 = vperm.xlu1 %1177, %v1186_v2  }
 0x282   : > { %649 = vperm.xlu1 %1177, %v1188_v4  }
 0x286   : > { %652 = vperm.xlu1 %1177, %v1190_v5  }
 0x28a   : > { %655 = vperm.xlu1 %1177, %v1192_v6  }
 0x28e   : > { %658 = vperm.xlu1 %1177, %v1194_v7  }
 0x2f5   : > { %v638_v8 = vpop.permute.xlu1 %637 }
 0x2f6   : > { %v641_v12 = vpop.permute.xlu0 %640  ;;  %v663_v17 = vrot.slane %v638_v8, %v1526_v60 }
 0x2f7   : > { %v667_v14 = vrot.slane %v641_v12, %v1526_v60 }
 0x2f9   : > { %v644_v9 = vpop.permute.xlu1 %643  ;;  %v692_v24 = vsel %vm544_vm2, %v667_v14, %v663_v17 }
 0x2fa   : > { %v671_v20 = vrot.slane %v644_v9, %v1526_v60 }
 0x2fc   : > { %v693_v34 = vsel %vm546_vm3, %v671_v20, %v692_v24 }
 0x2fd   : > { %v647_v10 = vpop.permute.xlu1 %646 }
 0x2fe   : > { %v675_v21 = vrot.slane %v647_v10, %v1526_v60 }
 0x300   : > { %v694_v36 = vsel %vm548_vm4, %v675_v21, %v693_v34 }
 0x301   : > { %v650_v11 = vpop.permute.xlu1 %649 }
 0x302   : > { %v679_v22 = vrot.slane %v650_v11, %v1526_v60 }
 0x304   : > { %v695_v38 = vsel %vm550_vm5, %v679_v22, %v694_v36 }
 0x305   : > { %v653_v13 = vpop.permute.xlu1 %652 }
 0x306   : > { %v683_v33 = vrot.slane %v653_v13, %v1526_v60 }
 0x308   : > { %v696_v40 = vsel %vm552_vm6, %v683_v33, %v695_v38 }
 0x309   : > { %v656_v23 = vpop.permute.xlu1 %655 }
 0x30a   : > { %v687_v35 = vrot.slane %v656_v23, %v1526_v60 }
 0x30c   : > { %v697_v42 = vsel %vm554_vm7, %v687_v35, %v696_v40 }
 0x30d   : > { %v659_v39 = vpop.permute.xlu1 %658 }
 0x30e   : > { %v691_v41 = vrot.slane %v659_v39, %v1526_v60 }
 0x310   : > { %v698_v43 = vsel %vm556_vm8, %v691_v41, %v697_v42 }
 0x311   : > { %v700_v45 = vsel %vm559_vm9, %v698_v43, 0.0 }
 0x312   : > { %701 = vadd.xlane.f32.xlu1 %v700_v45 }
 0x323   : > { %867 = vrot.lane.b32.xlu1 %v1074_v46, %s1300_s8 }
 0x39f   : > { %v702_v47 = vpop.xlane.xlu1 %701 }
 0x3a0   : > { %1195 = vrcp.f32 %v702_v47 }
 0x3a3   : > { %v1616_v36 = vpop.permute.xlu1 %867 }
 0x3aa   : > { %v1196_v49 = vpop.eup %1195 }
 0x3ab   : > { %v704_v50 = vmul.f32 %v1196_v49, %v702_v47 }
 0x3ad   : > { %v705_v51 = vsub.f32 2.0, %v704_v50 }
 0x3af   : > { %v706_v53 = vmul.f32 %v1196_v49, %v705_v51 }
 0x3b1   : > { %v715_v54 = vrot.slane %v706_v53, %v570_v29  ;;  %v719_v59 = vrot.slane %v706_v53, %v574_v30  ;;  %v711_v62 = vrot.slane %v706_v53, %v566_v27  ;;  %v723_v1 = vrot.slane %v706_v53, %v578_v32 }
 0x3b2   : > { %v727_v29 = vrot.slane %v706_v53, %v582_v37  ;;  %v731_v30 = vrot.slane %v706_v53, %v586_v44  ;;  %v735_v27 = vrot.slane %v706_v53, %v590_v48  ;;  %v739_v32 = vrot.slane %v706_v53, %v594_v52 }
 0x3b3   : > { %v749_v55 = vmul.f32 %v1182_v57, %v715_v54  ;;  %v750_v61 = vmul.f32 %v1184_v63, %v719_v59  ;;  %v748_v0 = vmul.f32 %v1566_v56, %v711_v62  ;;  %v751_v3 = vmul.f32 %v1186_v2, %v723_v1 }
 0x3b4   : > { %v752_v57 = vmul.f32 %v1188_v4, %v727_v29  ;;  %v753_v63 = vmul.f32 %v1190_v5, %v731_v30  ;;  %v754_v56 = vmul.f32 %v1192_v6, %v735_v27  ;;  %v755_v2 = vmul.f32 %v1194_v7, %v739_v32 }
 0x3b5   : > { %763 = vperm.xlu0 %1178, %v749_v55  }
 0x3b9   : > { %768 = vperm.xlu0 %1178, %v750_v61  }
 0x3bd   : > { %758 = vperm.xlu0 %1178, %v748_v0  }
 0x3c1   : > { %773 = vperm.xlu0 %1178, %v751_v3  }
 0x3c5   : > { %778 = vperm.xlu0 %1178, %v752_v57  }
 0x3c9   : > { %783 = vperm.xlu0 %1178, %v753_v63  }
 0x3cd   : > { %788 = vperm.xlu0 %1178, %v754_v56  }
 0x3d1   : > { %793 = vperm.xlu0 %1178, %v755_v2  }
 0x434   : > { %v764_v37 = vpop.permute.xlu0 %763 }
 0x435   : > { %v797_v4 = vmul.f32 %v1488_v15, %v764_v37  ;;  %v912_v39 = vrot.slane %v764_v37, %v1526_v60 }
 0x437   : > { %v812_v8 = vsel %vm804_vm10, %v797_v4, 0.0 }
 0x438   : > { %v813_v44 = vrot.slane %v812_v8, 4  ;;  %v769_v9 = vpop.permute.xlu0 %768 }
 0x439   : > { %v798_v5 = vmul.f32 %v769_v9, %v1507_v28  ;;  %v916_v49 = vrot.slane %v769_v9, %v1526_v60 }
 0x43a   : > { %v814_v10 = vadd.f32 %v813_v44, %v812_v8 }
 0x43b   : > { %v819_v48 = vsel %vm804_vm10, %v798_v5, 0.0 }
 0x43c   : > { %v815_v6 = vrot.slane %v814_v10, 2  ;;  %v820_v11 = vrot.slane %v819_v48, 4  ;;  %v759_v58 = vpop.permute.xlu0 %758 }
 0x43d   : > { %v796_v52 = vmul.f32 %v759_v58, %v1493_v18  ;;  %v908_v24 = vrot.slane %v759_v58, %v1526_v60 }
 0x43e   : > { %v816_v7 = vadd.f32 %v815_v6, %v814_v10  ;;  %v821_v12 = vadd.f32 %v820_v11, %v819_v48 }
 0x43f   : > { %v805_v13 = vsel %vm804_vm10, %v796_v52, 0.0  ;;  %v937_v43 = vsel %vm544_vm2, %v912_v39, %v908_v24 }
 0x440   : > { %v817_v14 = vrot.slane %v816_v7, 1  ;;  %v822_v15 = vrot.slane %v821_v12, 2  ;;  %v806_v17 = vrot.slane %v805_v13, 4  ;;  %v774_v20 = vpop.permute.xlu0 %773  ;;  %v938_v62 = vsel %vm546_vm3, %v916_v49, %v937_v43 }
 0x441   : > { %v799_v21 = vmul.f32 %v1502_v25, %v774_v20  ;;  %v920_v45 = vrot.slane %v774_v20, %v1526_v60 }
 0x442   : > { %v823_v28 = vadd.f32 %v822_v15, %v821_v12  ;;  %v807_v22 = vadd.f32 %v806_v17, %v805_v13  ;;  %v818_v23 = vadd.f32 %v817_v14, %v816_v7 }
 0x443   : > { %v826_v33 = vsel %vm804_vm10, %v799_v21, 0.0  ;;  %v939_v3 = vsel %vm548_vm4, %v920_v45, %v938_v62 }
 0x444   : > { %v824_v34 = vrot.slane %v823_v28, 1  ;;  %v808_v18 = vrot.slane %v807_v22, 2  ;;  %v827_v35 = vrot.slane %v826_v33, 4  ;;  %v779_v38 = vpop.permute.xlu0 %778  ;;  %v871_v46 = vadd.f32 %v1616_v36, %v818_v23 }
 0x445   : > { %v800_v40 = vmul.f32 %v779_v38, %v1495_v19  ;;  %v924_v55 = vrot.slane %v779_v38, %v1526_v60 }
 0x446   : > { %v825_v41 = vadd.f32 %v824_v34, %v823_v28  ;;  %v809_v25 = vadd.f32 %v808_v18, %v807_v22  ;;  %v828_v42 = vadd.f32 %v827_v35, %v826_v33  ;;  %v886_v29 = vrot.slane %v871_v46, 7 }
 0x447   : > { %v833_v47 = vsel %vm804_vm10, %v800_v40, 0.0  ;;  %v940_v37 = vsel %vm550_vm5, %v924_v55, %v939_v3 }
 0x448   : > { %v810_v50 = vrot.slane %v809_v25, 1  ;;  %v829_v51 = vrot.slane %v828_v42, 2  ;;  %v834_v53 = vrot.slane %v833_v47, 4  ;;  %v784_v19 = vpop.permute.xlu0 %783  ;;  %v872_v54 = vadd.f32 %v1616_v36, %v825_v41 }
 0x449   : > { %v801_v59 = vmul.f32 %v1490_v16, %v784_v19  ;;  %v928_v30 = vrot.slane %v784_v19, %v1526_v60 }
 0x44a   : > { %v811_v61 = vadd.f32 %v810_v50, %v809_v25  ;;  %v830_v0 = vadd.f32 %v829_v51, %v828_v42  ;;  %v835_v1 = vadd.f32 %v834_v53, %v833_v47  ;;  %v888_v2 = vrot.slane %v872_v54, 6 }
 0x44b   : > { %v840_v57 = vsel %vm804_vm10, %v801_v59, 0.0  ;;  %v941_v48 = vsel %vm552_vm6, %v928_v30, %v940_v37 }
 0x44c   : > { %v831_v63 = vrot.slane %v830_v0, 1  ;;  %v870_v27 = vadd.f32 %v1616_v36, %v811_v61  ;;  %v836_v16 = vrot.slane %v835_v1, 2  ;;  %v841_v56 = vrot.slane %v840_v57, 4  ;;  %v789_v32 = vpop.permute.xlu0 %788 }
 0x44d   : > { %v802_v4 = vmul.f32 %v789_v32, %v1509_v31  ;;  %v932_v8 = vrot.slane %v789_v32, %v1526_v60 }
 0x44e   : > { %v832_v44 = vadd.f32 %v831_v63, %v830_v0  ;;  %v837_v9 = vadd.f32 %v836_v16, %v835_v1  ;;  %v842_v5 = vadd.f32 %v841_v56, %v840_v57  ;;  %v887_v10 = vsel %vm544_vm2, %v886_v29, %v870_v27 }
 0x44f   : > { %v847_v6 = vsel %vm804_vm10, %v802_v4, 0.0  ;;  %v889_v11 = vsel %vm546_vm3, %v888_v2, %v887_v10  ;;  %v942_v13 = vsel %vm554_vm7, %v932_v8, %v941_v48 }
 0x450   : > { %v873_v58 = vadd.f32 %v1616_v36, %v832_v44  ;;  %v838_v52 = vrot.slane %v837_v9, 1  ;;  %v843_v7 = vrot.slane %v842_v5, 2  ;;  %v848_v31 = vrot.slane %v847_v6, 4  ;;  %v794_v12 = vpop.permute.xlu0 %793 }
 0x451   : > { %v803_v14 = vmul.f32 %v1504_v26, %v794_v12  ;;  %v936_v15 = vrot.slane %v794_v12, %v1526_v60 }
 0x452   : > { %v839_v17 = vadd.f32 %v838_v52, %v837_v9  ;;  %v844_v20 = vadd.f32 %v843_v7, %v842_v5  ;;  %v849_v21 = vadd.f32 %v848_v31, %v847_v6  ;;  %v890_v28 = vrot.slane %v873_v58, 5 }
 0x453   : > { %v854_v22 = vsel %vm804_vm10, %v803_v14, 0.0  ;;  %v943_v23 = vsel %vm556_vm8, %v936_v15, %v942_v13 }
 0x454   : > { %v874_v24 = vadd.f32 %v1616_v36, %v839_v17  ;;  %v845_v33 = vrot.slane %v844_v20, 1  ;;  %v850_v34 = vrot.slane %v849_v21, 2  ;;  %v855_v26 = vrot.slane %v854_v22, 4  ;;  %945 = vst.msk [vmem:[%s296_s11] sm:$0xff] %vm559_vm9, %v943_v23 }
 0x455   : > { %v891_v60 = vsel %vm548_vm4, %v890_v28, %v889_v11 }
 0x456   : > { %v892_v18 = vrot.slane %v874_v24, 4  ;;  %v846_v35 = vadd.f32 %v845_v33, %v844_v20  ;;  %v851_v38 = vadd.f32 %v850_v34, %v849_v21  ;;  %v856_v39 = vadd.f32 %v855_v26, %v854_v22 }
 0x458   : > { %v875_v40 = vadd.f32 %v1616_v36, %v846_v35  ;;  %v852_v41 = vrot.slane %v851_v38, 1  ;;  %v857_v25 = vrot.slane %v856_v39, 2  ;;  %v893_v42 = vsel %vm550_vm5, %v892_v18, %v891_v60 }
 0x45a   : > { %v853_v43 = vadd.f32 %v852_v41, %v851_v38  ;;  %v858_v45 = vadd.f32 %v857_v25, %v856_v39  ;;  %v894_v46 = vrot.slane %v875_v40, 3 }
 0x45c   : > { %v859_v47 = vrot.slane %v858_v45, 1  ;;  %v876_v49 = vadd.f32 %v1616_v36, %v853_v43  ;;  %v895_v50 = vsel %vm552_vm6, %v894_v46, %v893_v42 }
 0x45e   : > { %v860_v51 = vadd.f32 %v859_v47, %v858_v45  ;;  %v896_v53 = vrot.slane %v876_v49, 2 }
 0x460   : > { %v877_v19 = vadd.f32 %v1616_v36, %v860_v51  ;;  %v897_v54 = vsel %vm554_vm7, %v896_v53, %v895_v50 }
 0x462   : > { %v898_v55 = vrot.slane %v877_v19, 1 }
 0x464   : > { %v899_v59 = vsel %vm556_vm8, %v898_v55, %v897_v54 }
 0x465   : > { %900 = vrot.lane.b32.xlu0 %v899_v59, %s1301_s10 }
 0x4d7   : > { %v901_v61 = vpop.permute.xlu0 %900 }
 0x4d8   : > { %904 = vst.msk [vmem:[%s292_s14] sm:$0xff] %vm903_vm11, %v901_v61 }
 0x4d9 PF: > { %p18_p1 = scmp.ge.s32.totalorder %s1381_s7, 4   ;;  %s1704_s21 = smov %s1285_s22 }
 0x4da   : > { %s1705_s22 = smov %s1289_s23  ;;  %s1706_s23 = smov %s1410_s28 }
 0x4db   : > { %s1707_s24 = smov %s1381_s7  ;;  %20 = sbr.rel (!%p18_p1) target bundleno = 4 (0x4), region = 96 }
 0x4e2   :  { %979 = vsyncpa [#allocation3], 1 }
 0x4e3   :  { %981 = vsyncpa [#allocation3 + $0x1], 1 }
 0x4e4   :  { %982 = vsyncpa [#allocation5], 1 }

</bundles_post_ra>
